<compile_context>
chip_gen: v7x
topology: tpu7x:2x2x1
jax: 0.10.0
libtpu: 0.0.40
codegen_flags: <defaults>
</compile_context>

<pallas_src>
import jax
import jax.numpy as jnp
from jax.experimental import pallas as pl
from jax.experimental.pallas import tpu as pltpu


def _round_up(x, m):
    return (x + m - 1) // m * m


def _qvalue_kernel(s_ref, a_ref,
                   w1s_ref, w1a_ref, b1_ref,
                   w2_ref, b2_ref,
                   w3_ref, b3_ref,
                   q_ref):
    """Fused twin-critic MLP for one batch tile (3 MXU matmuls total)."""
    # Layer 1: state and action contributions accumulated in the same f32 result
    # (replaces the torch.cat + single matmul of the reference module).
    h = jnp.dot(s_ref[...], w1s_ref[...], preferred_element_type=jnp.float32)
    h = h + jnp.dot(a_ref[...], w1a_ref[...], preferred_element_type=jnp.float32)
    h = jnp.maximum(h + b1_ref[...], 0.0)          # bias + ReLU in f32
    h = h.astype(w2_ref.dtype)                     # narrow only for next MXU push

    # Layer 2: block-diagonal weight keeps the two critics' hidden states independent.
    h = jnp.dot(h, w2_ref[...], preferred_element_type=jnp.float32)
    h = jnp.maximum(h + b2_ref[...], 0.0)
    h = h.astype(w3_ref.dtype)

    # Layer 3: (tile_b, 2H) @ (2H, 2) -> [q1 | q2], one fused store.
    q = jnp.dot(h, w3_ref[...], preferred_element_type=jnp.float32) + b3_ref[...]
    q_ref[...] = q.astype(q_ref.dtype)


def fuse_params(params, state_dim, compute_dtype=jnp.bfloat16):
    """Build the fused / block-diagonal weights once (outside the hot path)."""
    H = params["w11"].shape[1]

    # Layer 1: concat the two critics along the output axis, then split rows into
    # the state part and the action part (so the kernel never needs a concat).
    w1 = jnp.concatenate([params["w11"], params["w21"]], axis=1)        # (in, 2H)
    w1s = w1[:state_dim].astype(compute_dtype)                          # (state_dim, 2H)
    w1a = w1[state_dim:].astype(compute_dtype)                          # (action_dim, 2H)
    b1 = jnp.concatenate([params["b11"], params["b21"]], axis=1).astype(jnp.float32)

    # Layer 2: block-diagonal (2H, 2H).
    zHH = jnp.zeros((H, H), jnp.float32)
    w2 = jnp.block([[params["w12"], zHH],
                    [zHH, params["w22"]]]).astype(compute_dtype)
    b2 = jnp.concatenate([params["b12"], params["b22"]], axis=1).astype(jnp.float32)

    # Layer 3: (2H, 2) — column 0 is critic 1, column 1 is critic 2.
    zH1 = jnp.zeros((H, 1), jnp.float32)
    w3 = jnp.block([[params["w13"], zH1],
                    [zH1, params["w23"]]]).astype(compute_dtype)
    b3 = jnp.concatenate([params["b13"], params["b23"]], axis=1).astype(jnp.float32)

    return dict(w1s=w1s, w1a=w1a, b1=b1, w2=w2, b2=b2, w3=w3, b3=b3)


def qvalue_net_forward(state, action, fused, *, tile_b=512,
                       compute_dtype=jnp.bfloat16):
    """Pallas equivalent of QValueNet.forward(state, action) -> (q1, q2)."""
    B, state_dim = state.shape
    action_dim = action.shape[1]

    # Batch tile: multiple of 8 (sublane), capped at tile_b.  Weights + two
    # double-buffered (tile_b, feat) activation tiles are tiny at these hidden
    # sizes, so this fits comfortably inside every chip's scoped-VMEM default.
    tile_b = max(8, min(tile_b, _round_up(B, 8)))
    Bp = _round_up(B, tile_b)

    s = state.astype(compute_dtype)
    a = action.astype(compute_dtype)
    if Bp != B:
        # Explicit zero-pad so padded rows are deterministic (sliced off below).
        s = jnp.pad(s, ((0, Bp - B), (0, 0)))
        a = jnp.pad(a, ((0, Bp - B), (0, 0)))

    grid = (Bp // tile_b,)

    in_specs = [
        pl.BlockSpec((tile_b, state_dim), lambda i: (i, 0)),     # streamed
        pl.BlockSpec((tile_b, action_dim), lambda i: (i, 0)),    # streamed
        pl.BlockSpec(fused["w1s"].shape, lambda i: (0, 0)),      # resident weights
        pl.BlockSpec(fused["w1a"].shape, lambda i: (0, 0)),
        pl.BlockSpec(fused["b1"].shape, lambda i: (0, 0)),
        pl.BlockSpec(fused["w2"].shape, lambda i: (0, 0)),
        pl.BlockSpec(fused["b2"].shape, lambda i: (0, 0)),
        pl.BlockSpec(fused["w3"].shape, lambda i: (0, 0)),
        pl.BlockSpec(fused["b3"].shape, lambda i: (0, 0)),
    ]
    out_specs = pl.BlockSpec((tile_b, 2), lambda i: (i, 0))

    q = pl.pallas_call(
        _qvalue_kernel,
        out_shape=jax.ShapeDtypeStruct((Bp, 2), jnp.float32),
        grid=grid,
        in_specs=in_specs,
        out_specs=out_specs,
        compiler_params=pltpu.CompilerParams(
            # Batch axis is independent -> shards across both TCs on v7x,
            # harmless on single-TC v5e/v6e.
            dimension_semantics=("parallel",),
        ),
    )(s, a, fused["w1s"], fused["w1a"], fused["b1"],
      fused["w2"], fused["b2"], fused["w3"], fused["b3"])

    q = q[:B]
    return q[:, 0:1], q[:, 1:2]


def init_params(key, state_dim, action_dim, hidden_dim):
    """Deterministic init matching nn.Linear shapes (weights stored as (in, out))."""
    in_dim = state_dim + action_dim

    def linear(key, fan_in, fan_out):
        kw, kb = jax.random.split(key)
        bound = 1.0 / jnp.sqrt(jnp.float32(fan_in))
        w = jax.random.uniform(kw, (fan_in, fan_out), jnp.float32, -bound, bound)
        b = jax.random.uniform(kb, (1, fan_out), jnp.float32, -bound, bound)
        return w, b

    keys = jax.random.split(key, 6)
    p = {}
    p["w11"], p["b11"] = linear(keys[0], in_dim, hidden_dim)
    p["w12"], p["b12"] = linear(keys[1], hidden_dim, hidden_dim)
    p["w13"], p["b13"] = linear(keys[2], hidden_dim, 1)
    p["w21"], p["b21"] = linear(keys[3], in_dim, hidden_dim)
    p["w22"], p["b22"] = linear(keys[4], hidden_dim, hidden_dim)
    p["w23"], p["b23"] = linear(keys[5], hidden_dim, 1)
    return p


if __name__ == "__main__":
    # NOTE: at these toy sizes the kernel is overhead-bound; it is intended for
    # large-batch training/eval paths.  Small shapes here only verify correctness.
    state_dim, action_dim, hidden_dim, batch = 12, 4, 32, 8

    key = jax.random.PRNGKey(0)
    k_params, k_state, k_action = jax.random.split(key, 3)

    params = init_params(k_params, state_dim, action_dim, hidden_dim)
    state = jax.random.normal(k_state, (batch, state_dim), jnp.float32)
    action = jax.random.normal(k_action, (batch, action_dim), jnp.float32)

    fused = fuse_params(params, state_dim)
    q1, q2 = qvalue_net_forward(state, action, fused)
    jax.block_until_ready((q1, q2))

    # Pure-JAX f32 reference of the original (un-fused) module math.
    x = jnp.concatenate([state, action], axis=1)

    def mlp(x, w1, b1, w2, b2, w3, b3):
        h = jnp.maximum(x @ w1 + b1, 0.0)
        h = jnp.maximum(h @ w2 + b2, 0.0)
        return h @ w3 + b3

    q1_ref = mlp(x, params["w11"], params["b11"], params["w12"], params["b12"],
                 params["w13"], params["b13"])
    q2_ref = mlp(x, params["w21"], params["b21"], params["w22"], params["b22"],
                 params["w23"], params["b23"])

    assert q1.shape == (batch, 1) and q2.shape == (batch, 1)
    # bf16 inputs/weights with f32 accumulation vs. an f32 reference.
    assert jnp.allclose(q1, q1_ref, atol=3e-2, rtol=3e-2), "q1 mismatch"
    assert jnp.allclose(q2, q2_ref, atol=3e-2, rtol=3e-2), "q2 mismatch"

    print("KERNEL_OK")
</pallas_src>

<mosaic_0001>
module attributes {stable_mosaic.version = 11 : i64} {
  func.func @_qvalue_kernel(%arg0: i32, %arg1: memref<8x12xbf16, #tpu.memory_space<vmem>>, %arg2: memref<8x4xbf16, #tpu.memory_space<vmem>>, %arg3: memref<12x64xbf16, #tpu.memory_space<vmem>>, %arg4: memref<4x64xbf16, #tpu.memory_space<vmem>>, %arg5: memref<1x64xf32, #tpu.memory_space<vmem>>, %arg6: memref<64x64xbf16, #tpu.memory_space<vmem>>, %arg7: memref<1x64xf32, #tpu.memory_space<vmem>>, %arg8: memref<64x2xbf16, #tpu.memory_space<vmem>>, %arg9: memref<1x2xf32, #tpu.memory_space<vmem>>, %arg10: memref<8x2xf32, #tpu.memory_space<vmem>>) attributes {dimension_semantics = [#tpu.dimension_semantics<parallel>], iteration_bounds = array<i64: 1>, scalar_prefetch = 0 : i64, scratch_operands = 0 : i64, tpu.core_type = #tpu.core_type<tc>, window_params = [{transform_indices = @transform_0, window_bounds = array<i64: 8, 12>}, {transform_indices = @transform_1, window_bounds = array<i64: 8, 4>}, {pipeline_mode = #tpu.pipeline_mode<synchronous>, transform_indices = @transform_2, window_bounds = array<i64: 12, 64>}, {pipeline_mode = #tpu.pipeline_mode<synchronous>, transform_indices = @transform_3, window_bounds = array<i64: 4, 64>}, {pipeline_mode = #tpu.pipeline_mode<synchronous>, transform_indices = @transform_4, window_bounds = array<i64: 1, 64>}, {pipeline_mode = #tpu.pipeline_mode<synchronous>, transform_indices = @transform_5, window_bounds = array<i64: 64, 64>}, {pipeline_mode = #tpu.pipeline_mode<synchronous>, transform_indices = @transform_6, window_bounds = array<i64: 1, 64>}, {pipeline_mode = #tpu.pipeline_mode<synchronous>, transform_indices = @transform_7, window_bounds = array<i64: 64, 2>}, {pipeline_mode = #tpu.pipeline_mode<synchronous>, transform_indices = @transform_8, window_bounds = array<i64: 1, 2>}, {transform_indices = @transform_9, window_bounds = array<i64: 8, 2>}]} {
    %c0 = arith.constant 0 : index
    %c0_0 = arith.constant 0 : index
    %0 = vector.load %arg1[%c0, %c0_0] : memref<8x12xbf16, #tpu.memory_space<vmem>>, vector<8x12xbf16>
    %c0_1 = arith.constant 0 : index
    %c0_2 = arith.constant 0 : index
    %1 = vector.load %arg3[%c0_1, %c0_2] : memref<12x64xbf16, #tpu.memory_space<vmem>>, vector<12x64xbf16>
    %cst = arith.constant dense<0.000000e+00> : vector<8x64xf32>
    %2 = tpu.matmul %0, %1, %cst {dimension_numbers = #tpu.dot_dimension_numbers<[1], [0], [0], [1], [0, 0, 1, 1], [], []>} : vector<8x12xbf16>, vector<12x64xbf16>, vector<8x64xf32> -> vector<8x64xf32>
    %c0_3 = arith.constant 0 : index
    %c0_4 = arith.constant 0 : index
    %3 = vector.load %arg2[%c0_3, %c0_4] : memref<8x4xbf16, #tpu.memory_space<vmem>>, vector<8x4xbf16>
    %c0_5 = arith.constant 0 : index
    %c0_6 = arith.constant 0 : index
    %4 = vector.load %arg4[%c0_5, %c0_6] : memref<4x64xbf16, #tpu.memory_space<vmem>>, vector<4x64xbf16>
    %cst_7 = arith.constant dense<0.000000e+00> : vector<8x64xf32>
    %5 = tpu.matmul %3, %4, %cst_7 {dimension_numbers = #tpu.dot_dimension_numbers<[1], [0], [0], [1], [0, 0, 1, 1], [], []>} : vector<8x4xbf16>, vector<4x64xbf16>, vector<8x64xf32> -> vector<8x64xf32>
    %6 = arith.addf %2, %5 : vector<8x64xf32>
    %c0_8 = arith.constant 0 : index
    %c0_9 = arith.constant 0 : index
    %7 = vector.load %arg5[%c0_8, %c0_9] : memref<1x64xf32, #tpu.memory_space<vmem>>, vector<1x64xf32>
    %8 = vector.broadcast %7 : vector<1x64xf32> to vector<8x64xf32>
    %9 = arith.addf %6, %8 : vector<8x64xf32>
    %cst_10 = arith.constant 0.000000e+00 : f32
    %10 = vector.broadcast %cst_10 : f32 to vector<8x64xf32>
    %11 = arith.maximumf %9, %10 : vector<8x64xf32>
    %12 = arith.truncf %11 : vector<8x64xf32> to vector<8x64xbf16>
    %c0_11 = arith.constant 0 : index
    %c0_12 = arith.constant 0 : index
    %13 = vector.load %arg6[%c0_11, %c0_12] : memref<64x64xbf16, #tpu.memory_space<vmem>>, vector<64x64xbf16>
    %cst_13 = arith.constant dense<0.000000e+00> : vector<8x64xf32>
    %14 = tpu.matmul %12, %13, %cst_13 {dimension_numbers = #tpu.dot_dimension_numbers<[1], [0], [0], [1], [0, 0, 1, 1], [], []>} : vector<8x64xbf16>, vector<64x64xbf16>, vector<8x64xf32> -> vector<8x64xf32>
    %c0_14 = arith.constant 0 : index
    %c0_15 = arith.constant 0 : index
    %15 = vector.load %arg7[%c0_14, %c0_15] : memref<1x64xf32, #tpu.memory_space<vmem>>, vector<1x64xf32>
    %16 = vector.broadcast %15 : vector<1x64xf32> to vector<8x64xf32>
    %17 = arith.addf %14, %16 : vector<8x64xf32>
    %cst_16 = arith.constant 0.000000e+00 : f32
    %18 = vector.broadcast %cst_16 : f32 to vector<8x64xf32>
    %19 = arith.maximumf %17, %18 : vector<8x64xf32>
    %20 = arith.truncf %19 : vector<8x64xf32> to vector<8x64xbf16>
    %c0_17 = arith.constant 0 : index
    %c0_18 = arith.constant 0 : index
    %21 = vector.load %arg8[%c0_17, %c0_18] : memref<64x2xbf16, #tpu.memory_space<vmem>>, vector<64x2xbf16>
    %cst_19 = arith.constant dense<0.000000e+00> : vector<8x2xf32>
    %22 = tpu.matmul %20, %21, %cst_19 {dimension_numbers = #tpu.dot_dimension_numbers<[1], [0], [0], [1], [0, 0, 1, 1], [], []>} : vector<8x64xbf16>, vector<64x2xbf16>, vector<8x2xf32> -> vector<8x2xf32>
    %c0_20 = arith.constant 0 : index
    %c0_21 = arith.constant 0 : index
    %23 = vector.load %arg9[%c0_20, %c0_21] : memref<1x2xf32, #tpu.memory_space<vmem>>, vector<1x2xf32>
    %24 = vector.broadcast %23 : vector<1x2xf32> to vector<8x2xf32>
    %25 = arith.addf %22, %24 : vector<8x2xf32>
    %c0_22 = arith.constant 0 : index
    %c0_23 = arith.constant 0 : index
    %26 = vector.load %arg10[%c0_22, %c0_23] : memref<8x2xf32, #tpu.memory_space<vmem>>, vector<8x2xf32>
    tpu.vector_store %arg10[%c0_22, %c0_23], %25 {strides = array<i32>} : memref<8x2xf32, #tpu.memory_space<vmem>>, vector<8x2xf32>,
    return
  }
  func.func @transform_0(%arg0: i32) -> (i32, i32) {
    %c0_i32 = arith.constant 0 : i32
    %c0_i32_0 = arith.constant 0 : i32
    return %arg0, %c0_i32 : i32, i32
  }
  func.func @transform_1(%arg0: i32) -> (i32, i32) {
    %c0_i32 = arith.constant 0 : i32
    %c0_i32_0 = arith.constant 0 : i32
    return %arg0, %c0_i32 : i32, i32
  }
  func.func @transform_2(%arg0: i32) -> (i32, i32) {
    %c0_i32 = arith.constant 0 : i32
    %c0_i32_0 = arith.constant 0 : i32
    %c0_i32_1 = arith.constant 0 : i32
    return %c0_i32, %c0_i32_0 : i32, i32
  }
  func.func @transform_3(%arg0: i32) -> (i32, i32) {
    %c0_i32 = arith.constant 0 : i32
    %c0_i32_0 = arith.constant 0 : i32
    %c0_i32_1 = arith.constant 0 : i32
    return %c0_i32, %c0_i32_0 : i32, i32
  }
  func.func @transform_4(%arg0: i32) -> (i32, i32) {
    %c0_i32 = arith.constant 0 : i32
    %c0_i32_0 = arith.constant 0 : i32
    %c0_i32_1 = arith.constant 0 : i32
    return %c0_i32, %c0_i32_0 : i32, i32
  }
  func.func @transform_5(%arg0: i32) -> (i32, i32) {
    %c0_i32 = arith.constant 0 : i32
    %c0_i32_0 = arith.constant 0 : i32
    %c0_i32_1 = arith.constant 0 : i32
    return %c0_i32, %c0_i32_0 : i32, i32
  }
  func.func @transform_6(%arg0: i32) -> (i32, i32) {
    %c0_i32 = arith.constant 0 : i32
    %c0_i32_0 = arith.constant 0 : i32
    %c0_i32_1 = arith.constant 0 : i32
    return %c0_i32, %c0_i32_0 : i32, i32
  }
  func.func @transform_7(%arg0: i32) -> (i32, i32) {
    %c0_i32 = arith.constant 0 : i32
    %c0_i32_0 = arith.constant 0 : i32
    %c0_i32_1 = arith.constant 0 : i32
    return %c0_i32, %c0_i32_0 : i32, i32
  }
  func.func @transform_8(%arg0: i32) -> (i32, i32) {
    %c0_i32 = arith.constant 0 : i32
    %c0_i32_0 = arith.constant 0 : i32
    %c0_i32_1 = arith.constant 0 : i32
    return %c0_i32, %c0_i32_0 : i32, i32
  }
  func.func @transform_9(%arg0: i32) -> (i32, i32) {
    %c0_i32 = arith.constant 0 : i32
    %c0_i32_0 = arith.constant 0 : i32
    return %arg0, %c0_i32 : i32, i32
  }
}

</mosaic_0001>

<bundles_post_ra>
// kernel: tpu_custom_call.1
= control target key start
LH: loop header
LB: loop body
LE: loop exit
PB: predicated region body
PF: predicated region fallthrough
CT: control target
= control target key end

     0   :  { %vm42_vm0 = vcmask 1041408   ;;  %vm95_vm1 = vcmask 1045504   ;;  %v399_v0 = vmov 0.0   ;;  %vm400_vm2 = vmmov 0   ;;  %s506_s3 = inlined_call_operand.vmem [shape: bf16[4,64], index: 3, kind: input, shape index: {}]   ;;  %s507_s2 = inlined_call_operand.vmem [shape: bf16[12,64], index: 2, kind: input, shape index: {}]   ;;  %s508_s1 = inlined_call_operand.vmem [shape: bf16[8,4], index: 1, kind: input, shape index: {}]   ;;  %s509_s0 = inlined_call_operand.vmem [shape: bf16[8,12], index: 0, kind: input, shape index: {}]   ;;  %s510_s5 = inlined_call_operand.vmem [shape: bf16[64,64], index: 5, kind: input, shape index: {}]   ;;  %s511_s7 = inlined_call_operand.vmem [shape: bf16[64,2], index: 7, kind: input, shape index: {}]   ;;  %s512_s4 = inlined_call_operand.vmem [shape: f32[1,64], index: 4, kind: input, shape index: {}]   ;;  %s513_s6 = inlined_call_operand.vmem [shape: f32[1,64], index: 6, kind: input, shape index: {}]   ;;  %s514_s8 = inlined_call_operand.vmem [shape: f32[1,2], index: 8, kind: input, shape index: {}]   ;;  %s515_s9 = inlined_call_operand.vmem [shape: f32[8,2], index: 9, kind: output, shape index: {}]  }
   0x1   :  { %352 = vmatprep.subr.bf16.mxu0 %v399_v0  ;;  %v37_v1 = vld [vmem:[%s506_s3] sm:$0x3]  ;;  %358 = vmatprep.subr.bf16.mxu1 %v399_v0  ;;  %vm38_vm3 = vcmask 31744   ;;  %vm91_vm4 = vcmask 97280   ;;  %v392_v8 = vld [vmem:[%s510_s5 + $0x8] sm:$0xff]   ;;  %v393_v9 = vld [vmem:[%s510_s5 + $0x10] sm:$0xff]  }
   0x2   :  { %v44_v2 = vsel %vm42_vm0, %v37_v1, 0  ;;  %354 = vmatprep.mubr.msk.bf16.mxu0 %vm400_vm2, %v399_v0  ;;  %v390_v3 = vld [vmem:[%s507_s2] sm:$0x3f]   ;;  %360 = vmatprep.mubr.msk.bf16.mxu1 %vm400_vm2, %v399_v0  ;;  %v394_v10 = vld [vmem:[%s510_s5 + $0x18] sm:$0xff]   ;;  %v396_v12 = vld [vmem:[%s511_s7 + $0x8] sm:$0xff]   ;;  %vm188_vm5 = vcmask 523264  }
   0x3   :  { %v36_v4 = vld [vmem:[%s508_s1] sm:$0xf]  ;;  %353 = vmatpush3.bf16.msra.mxu0 %v44_v2  ;;  %v97_v7 = vsel %vm95_vm1, %v390_v3, 0  ;;  %v397_v26 = vld [vmem:[%s511_s7 + $0x10] sm:$0xff]   ;;  %v398_v27 = vld [vmem:[%s511_s7 + $0x18] sm:$0xff]   ;;  %vm316_vm6 = vcmask 15360  }
   0x4   :  { %v33_v5 = vld [vmem:[%s509_s0] sm:$0xf]  ;;  %364 = vmatprep.subr.bf16.mxu0 %v399_v0  ;;  %359 = vmatpush3.bf16.msra.mxu1 %v97_v7 }
   0x5   :  { %v391_v6 = vld [vmem:[%s510_s5] sm:$0xff]   ;;  %376 = vmatprep.subr.bf16.mxu1 %v399_v0 }
   0x6   :  { %355 = vmatmul.mubr.msk.bf16.vlgmr.msra.gmra.mrb[0].mxu0 %vm38_vm3, %v36_v4  ;;  %v395_v11 = vld [vmem:[%s511_s7] sm:$0xff]  }
   0x7   :  { %365 = vmatpush3.bf16.msra.mxu0 %v391_v6  ;;  %372 = vmatprep.mubr.msk.bf16.mxu0 %vm400_vm2, %v399_v0  ;;  %v325_v17 = vld [vmem:[%s512_s4] ss:$0 sm:$0xff] }
   0x8   :  { %361 = vmatmul.mubr.msk.bf16.vlgmr.msra.gmra.mrb[0].mxu1 %vm91_vm4, %v33_v5  ;;  %366 = vmatprep.subr.bf16.mxu0 %v399_v0  ;;  %v326_v28 = vld [vmem:[%s513_s6] ss:$0 sm:$0xff] }
   0x9   :  { %384 = vmatprep.mubr.msk.bf16.mxu1 %vm400_vm2, %v399_v0  ;;  %377 = vmatpush3.bf16.msra.mxu1 %v395_v11  ;;  %v332_v36 = vld [vmem:[%s514_s8] ss:$0 sm:$0xff] }
   0xa   :  { %378 = vmatprep.subr.bf16.mxu1 %v399_v0 }
   0xb   :  { %367 = vmatpush3.bf16.msra.mxu0 %v392_v8 }
   0xc   :  { %368 = vmatprep.subr.bf16.mxu0 %v399_v0 }
   0xd   :  { %379 = vmatpush3.bf16.msra.mxu1 %v396_v12 }
   0xe   :  { %380 = vmatprep.subr.bf16.mxu1 %v399_v0 }
   0xf   :  { %369 = vmatpush3.bf16.msra.mxu0 %v393_v9 }
  0x10   :  { %370 = vmatprep.subr.bf16.mxu0 %v399_v0 }
  0x11   :  { %381 = vmatpush3.bf16.msra.mxu1 %v397_v26 }
  0x12   :  { %382 = vmatprep.subr.bf16.mxu1 %v399_v0 }
  0x13   :  { %371 = vmatpush3.bf16.msra.mxu0 %v394_v10 }
  0x15   :  { %383 = vmatpush3.bf16.msra.mxu1 %v398_v27 }
  0xd9   :  { %v80_v13 = vpop.f32.mrb[0].mxu0 }
  0xda   :  { %v356_v14 = vpop.f32.mrb[1].mxu0 }
  0xdb   :  { %v83_v15 = vpop.f32.mrb[2].mxu0  ;;  %v133_v16 = vpop.f32.mrb[0].mxu1 }
  0xdc   :  { %v134_v18 = vadd.f32 %v133_v16, %v80_v13  ;;  %v357_v19 = vpop.f32.mrb[3].mxu0  ;;  %v362_v20 = vpop.f32.mrb[1].mxu1 }
  0xdd   :  { %v136_v21 = vpop.f32.mrb[2].mxu1 }
  0xde   :  { %v146_v22 = vadd.f32 %v325_v17, %v134_v18  ;;  %v363_v23 = vpop.f32.mrb[3].mxu1 }
  0xe0   :  { %v147_v24 = vmax.f32 %v146_v22, 0.0 }
  0xe2   :  { %v148_v25 = vpack.c.bf16 %v147_v24, %v147_v24 }
  0xe4   :  { %373 = vmatmul.mubr.msk.bf16.vlgmr.msra.gmra.mrb[4].mxu0 %vm188_vm5, %v148_v25 }
 0x1b7   :  { %v226_v29 = vpop.f32.mrb[4].mxu0 }
 0x1b8   :  { %v227_v30 = vadd.f32 %v326_v28, %v226_v29  ;;  %v374_v31 = vpop.f32.mrb[5].mxu0 }
 0x1b9   :  { %v229_v32 = vpop.f32.mrb[6].mxu0 }
 0x1ba   :  { %v232_v33 = vmax.f32 %v227_v30, 0.0  ;;  %v375_v34 = vpop.f32.mrb[7].mxu0 }
 0x1bc   :  { %v233_v35 = vpack.c.bf16 %v232_v33, %v232_v33 }
 0x1be   :  { %385 = vmatmul.mubr.msk.bf16.vlgmr.msra.gmra.mrb[4].mxu1 %vm188_vm5, %v233_v35 }
 0x291   :  { %v310_v37 = vpop.f32.mrb[4].mxu1 }
 0x292   :  { %v311_v38 = vadd.f32 %v332_v36, %v310_v37  ;;  %v386_v39 = vpop.f32.mrb[5].mxu1 }
 0x293   :  { %v313_v40 = vpop.f32.mrb[6].mxu1 }
 0x294   :  { %317 = vst.msk [vmem:[%s515_s9] sm:$0xff] %vm316_vm6, %v311_v38  ;;  %v387_v41 = vpop.f32.mrb[7].mxu1 }

</bundles_post_ra>
